<compile_context>
chip_gen: v7x
topology: tpu7x:2x2x1
jax: 0.10.0
libtpu: 0.0.40
codegen_flags: <defaults>
</compile_context>

<pallas_src>
import functools

import jax
import jax.numpy as jnp
from jax.experimental import pallas as pl
from jax.experimental.pallas import tpu as pltpu

LANES = 128
F_IN, HID, OUT = 8, 10, 4
HID_P = LANES  # hidden padded to one full lane width (numerically exact, see above)


def mlp_kernel(x_ref, w1_ref, b1_ref, w2_ref, b2_ref, o_ref):
    # fc1: x @ w1 + b1, ReLU   (MXU matmul, f32 accumulation; add/ReLU on VPU in f32)
    h = jnp.dot(x_ref[...], w1_ref[...], preferred_element_type=jnp.float32)
    h = jnp.maximum(h + b1_ref[...], 0.0)
    # fc2: h @ w2 + b2.  Output stays narrow (4 lanes): a masked vst per 8 rows is far
    # cheaper than writing (and later slicing) a 128-wide padded slab.
    y = jnp.dot(h.astype(w2_ref.dtype), w2_ref[...], preferred_element_type=jnp.float32)
    o_ref[...] = (y + b2_ref[...]).astype(o_ref.dtype)


def prepare_params(w1, b1, w2, b2, dtype=jnp.float32):
    """One-time padding/casting of the tiny resident weights (hoisted out of forward).

    w1: [8, 10], b1: [10], w2: [10, 4], b2: [4]  (weights in [in, out] layout).
    """
    w1p = jnp.zeros((F_IN, HID_P), dtype).at[:, :HID].set(w1.astype(dtype))
    b1p = jnp.zeros((1, HID_P), jnp.float32).at[0, :HID].set(b1.astype(jnp.float32))
    w2p = jnp.zeros((HID_P, OUT), dtype).at[:HID, :].set(w2.astype(dtype))
    b2p = jnp.reshape(b2.astype(jnp.float32), (1, OUT))
    return w1p, b1p, w2p, b2p


def _choose_tb(B, block_b):
    """Pick the batch tile (multiple of 8 sublanes). Lexicographic preference:
      1. at least 2 tiles when the batch allows it (v7x megacore: both TCs stream),
      2. minimal batch padding (ideally the tile divides the sublane-rounded batch),
      3. an even tile count (balanced split across the 2 TensorCores),
      4. the largest remaining tile (fewer per-step overheads, longer DMAs).
    Never shrinks below half of the requested block_b cap."""
    B8 = -(-B // 8) * 8
    cap = min(max(8, (block_b // 8) * 8), B8)
    if B8 <= 8:
        return 8
    best_t, best_key = cap, None
    for t in range(cap, max(8, cap // 2) - 1, -8):
        n = -(-B8 // t)
        key = (n < 2, n * t - B8, n % 2, cap - t)
        if best_key is None or key < best_key:
            best_t, best_key = t, key
    return best_t


def _mlp_pallas(xp, w1p, b1p, w2p, b2p, *, tb):
    Bp = xp.shape[0]
    itemsize = jnp.dtype(xp.dtype).itemsize
    flops = 2 * Bp * (F_IN * HID_P + HID_P * OUT)
    bytes_accessed = (
        Bp * F_IN * itemsize + Bp * OUT * itemsize
        + w1p.size * jnp.dtype(w1p.dtype).itemsize
        + w2p.size * jnp.dtype(w2p.dtype).itemsize
        + (b1p.size + b2p.size) * 4
    )
    return pl.pallas_call(
        mlp_kernel,
        out_shape=jax.ShapeDtypeStruct((Bp, OUT), xp.dtype),
        grid=(Bp // tb,),
        in_specs=[
            pl.BlockSpec((tb, F_IN), lambda i: (i, 0)),      # x: tiled over batch
            pl.BlockSpec((F_IN, HID_P), lambda i: (0, 0)),   # w1: resident
            pl.BlockSpec((1, HID_P), lambda i: (0, 0)),      # b1: resident
            pl.BlockSpec((HID_P, OUT), lambda i: (0, 0)),    # w2: resident
            pl.BlockSpec((1, OUT), lambda i: (0, 0)),        # b2: resident
        ],
        out_specs=pl.BlockSpec((tb, OUT), lambda i: (i, 0)), # unpadded (tb, 4) output
        compiler_params=pltpu.CompilerParams(
            dimension_semantics=("parallel",),               # shard batch tiles across TCs
        ),
        cost_estimate=pl.CostEstimate(
            flops=flops, transcendentals=0, bytes_accessed=bytes_accessed),
    )(xp, w1p, b1p, w2p, b2p)


@functools.partial(jax.jit, static_argnames=("block_b",))
def regular_model_forward(x, params, *, block_b=2048):
    """x: [B, 8]; params = prepare_params(...). Returns [B, 4] (f32 math throughout)."""
    w1p, b1p, w2p, b2p = params
    B = x.shape[0]
    tb = _choose_tb(B, block_b)
    Bp = pl.cdiv(B, tb) * tb
    xp = x if Bp == B else jnp.pad(x, ((0, Bp - B), (0, 0)))  # rare: tile chooser avoids this
    out = _mlp_pallas(xp, w1p, b1p, w2p, b2p, tb=tb)
    return out if Bp == B else out[:B]


def init_params(key):
    # Deterministic init mimicking nn.Linear's uniform(-1/sqrt(fan_in), 1/sqrt(fan_in)).
    k1, k2, k3, k4 = jax.random.split(key, 4)
    bound1 = 1.0 / jnp.sqrt(8.0)
    bound2 = 1.0 / jnp.sqrt(10.0)
    w1 = jax.random.uniform(k1, (F_IN, HID), jnp.float32, -bound1, bound1)  # [in, out]
    b1 = jax.random.uniform(k2, (HID,), jnp.float32, -bound1, bound1)
    w2 = jax.random.uniform(k3, (HID, OUT), jnp.float32, -bound2, bound2)   # [in, out]
    b2 = jax.random.uniform(k4, (OUT,), jnp.float32, -bound2, bound2)
    return w1, b1, w2, b2


if __name__ == "__main__":
    key = jax.random.PRNGKey(0)
    pkey, xkey = jax.random.split(key)
    w1, b1, w2, b2 = init_params(pkey)
    params = prepare_params(w1, b1, w2, b2)  # padded once, reused across forwards

    batch = 8
    x = jax.random.normal(xkey, (batch, F_IN), jnp.float32)

    out = regular_model_forward(x, params)
    out = jax.block_until_ready(out)

    # Reference: relu(x @ W1 + b1) @ W2 + b2 (same math as the PyTorch forward).
    ref = jnp.maximum(x @ w1 + b1[None, :], 0.0) @ w2 + b2[None, :]
    assert out.shape == (batch, OUT), out.shape
    assert jnp.allclose(out, ref, atol=1e-5, rtol=1e-5), float(jnp.abs(out - ref).max())

    print("KERNEL_OK")
</pallas_src>

<mosaic_0001>
module attributes {stable_mosaic.version = 11 : i64} {
  func.func @mlp_kernel(%arg0: i32, %arg1: memref<8x8xf32, #tpu.memory_space<vmem>>, %arg2: memref<8x128xf32, #tpu.memory_space<vmem>>, %arg3: memref<1x128xf32, #tpu.memory_space<vmem>>, %arg4: memref<128x4xf32, #tpu.memory_space<vmem>>, %arg5: memref<1x4xf32, #tpu.memory_space<vmem>>, %arg6: memref<8x4xf32, #tpu.memory_space<vmem>>) attributes {dimension_semantics = [#tpu.dimension_semantics<parallel>], iteration_bounds = array<i64: 1>, scalar_prefetch = 0 : i64, scratch_operands = 0 : i64, tpu.core_type = #tpu.core_type<tc>, window_params = [{transform_indices = @transform_0, window_bounds = array<i64: 8, 8>}, {pipeline_mode = #tpu.pipeline_mode<synchronous>, transform_indices = @transform_1, window_bounds = array<i64: 8, 128>}, {pipeline_mode = #tpu.pipeline_mode<synchronous>, transform_indices = @transform_2, window_bounds = array<i64: 1, 128>}, {pipeline_mode = #tpu.pipeline_mode<synchronous>, transform_indices = @transform_3, window_bounds = array<i64: 128, 4>}, {pipeline_mode = #tpu.pipeline_mode<synchronous>, transform_indices = @transform_4, window_bounds = array<i64: 1, 4>}, {transform_indices = @transform_5, window_bounds = array<i64: 8, 4>}]} {
    %c0 = arith.constant 0 : index
    %c0_0 = arith.constant 0 : index
    %0 = vector.load %arg1[%c0, %c0_0] : memref<8x8xf32, #tpu.memory_space<vmem>>, vector<8x8xf32>
    %c0_1 = arith.constant 0 : index
    %c0_2 = arith.constant 0 : index
    %1 = vector.load %arg2[%c0_1, %c0_2] : memref<8x128xf32, #tpu.memory_space<vmem>>, vector<8x128xf32>
    %cst = arith.constant dense<0.000000e+00> : vector<8x128xf32>
    %2 = tpu.matmul %0, %1, %cst {dimension_numbers = #tpu.dot_dimension_numbers<[1], [0], [0], [1], [0, 0, 1, 1], [], []>} : vector<8x8xf32>, vector<8x128xf32>, vector<8x128xf32> -> vector<8x128xf32>
    %c0_3 = arith.constant 0 : index
    %c0_4 = arith.constant 0 : index
    %3 = vector.load %arg3[%c0_3, %c0_4] : memref<1x128xf32, #tpu.memory_space<vmem>>, vector<1x128xf32>
    %4 = vector.broadcast %3 : vector<1x128xf32> to vector<8x128xf32>
    %5 = arith.addf %2, %4 : vector<8x128xf32>
    %cst_5 = arith.constant 0.000000e+00 : f32
    %6 = vector.broadcast %cst_5 : f32 to vector<8x128xf32>
    %7 = arith.maximumf %5, %6 : vector<8x128xf32>
    %c0_6 = arith.constant 0 : index
    %c0_7 = arith.constant 0 : index
    %8 = vector.load %arg4[%c0_6, %c0_7] : memref<128x4xf32, #tpu.memory_space<vmem>>, vector<128x4xf32>
    %cst_8 = arith.constant dense<0.000000e+00> : vector<8x4xf32>
    %9 = tpu.matmul %7, %8, %cst_8 {dimension_numbers = #tpu.dot_dimension_numbers<[1], [0], [0], [1], [0, 0, 1, 1], [], []>} : vector<8x128xf32>, vector<128x4xf32>, vector<8x4xf32> -> vector<8x4xf32>
    %c0_9 = arith.constant 0 : index
    %c0_10 = arith.constant 0 : index
    %10 = vector.load %arg5[%c0_9, %c0_10] : memref<1x4xf32, #tpu.memory_space<vmem>>, vector<1x4xf32>
    %11 = vector.broadcast %10 : vector<1x4xf32> to vector<8x4xf32>
    %12 = arith.addf %9, %11 : vector<8x4xf32>
    %c0_11 = arith.constant 0 : index
    %c0_12 = arith.constant 0 : index
    %13 = vector.load %arg6[%c0_11, %c0_12] : memref<8x4xf32, #tpu.memory_space<vmem>>, vector<8x4xf32>
    tpu.vector_store %arg6[%c0_11, %c0_12], %12 {strides = array<i32>} : memref<8x4xf32, #tpu.memory_space<vmem>>, vector<8x4xf32>,
    return
  }
  func.func @transform_0(%arg0: i32) -> (i32, i32) {
    %c0_i32 = arith.constant 0 : i32
    %c0_i32_0 = arith.constant 0 : i32
    return %arg0, %c0_i32 : i32, i32
  }
  func.func @transform_1(%arg0: i32) -> (i32, i32) {
    %c0_i32 = arith.constant 0 : i32
    %c0_i32_0 = arith.constant 0 : i32
    %c0_i32_1 = arith.constant 0 : i32
    return %c0_i32, %c0_i32_0 : i32, i32
  }
  func.func @transform_2(%arg0: i32) -> (i32, i32) {
    %c0_i32 = arith.constant 0 : i32
    %c0_i32_0 = arith.constant 0 : i32
    %c0_i32_1 = arith.constant 0 : i32
    return %c0_i32, %c0_i32_0 : i32, i32
  }
  func.func @transform_3(%arg0: i32) -> (i32, i32) {
    %c0_i32 = arith.constant 0 : i32
    %c0_i32_0 = arith.constant 0 : i32
    %c0_i32_1 = arith.constant 0 : i32
    return %c0_i32, %c0_i32_0 : i32, i32
  }
  func.func @transform_4(%arg0: i32) -> (i32, i32) {
    %c0_i32 = arith.constant 0 : i32
    %c0_i32_0 = arith.constant 0 : i32
    %c0_i32_1 = arith.constant 0 : i32
    return %c0_i32, %c0_i32_0 : i32, i32
  }
  func.func @transform_5(%arg0: i32) -> (i32, i32) {
    %c0_i32 = arith.constant 0 : i32
    %c0_i32_0 = arith.constant 0 : i32
    return %arg0, %c0_i32 : i32, i32
  }
}

</mosaic_0001>

<bundles_post_ra>
// kernel: regular_model_forward.1
= control target key start
LH: loop header
LB: loop body
LE: loop exit
PB: predicated region body
PF: predicated region fallthrough
CT: control target
= control target key end

     0   :  { %vm29_vm0 = vcmask 64512   ;;  %v292_v0 = vmov 0.0   ;;  %vm293_vm1 = vmmov 0   ;;  %v294_v4 = vmov 0.0|0.0   ;;  %s388_s1 = inlined_call_operand.vmem [shape: f32[8,128], index: 1, kind: input, shape index: {}]   ;;  %s389_s0 = inlined_call_operand.vmem [shape: f32[8,8], index: 0, kind: input, shape index: {}]   ;;  %s390_s3 = inlined_call_operand.vmem [shape: f32[128,4], index: 3, kind: input, shape index: {}]   ;;  %s391_s2 = inlined_call_operand.vmem [shape: f32[1,128], index: 2, kind: input, shape index: {}]   ;;  %s392_s4 = inlined_call_operand.vmem [shape: f32[1,4], index: 4, kind: input, shape index: {}]   ;;  %s393_s5 = inlined_call_operand.vmem [shape: f32[8,4], index: 5, kind: output, shape index: {}]  }
   0x1   :  { %225 = vmatprep.subr.mxu0 %v292_v0  ;;  %v21_v1 = vld [vmem:[%s388_s1] sm:$0xff]  ;;  %227 = vmatprep.mubr.msk.f32.mxu0 %vm293_vm1, %v292_v0  ;;  %v105_v5 = vld [vmem:[%s390_s3 + $0x8] sm:$0xff]  ;;  %v106_v6 = vld [vmem:[%s390_s3 + $0x10] sm:$0xff]  ;;  %vm197_vm2 = vcmask 31744  }
   0x2   :  { %v20_v2 = vld [vmem:[%s389_s0] sm:$0xff]  ;;  %226 = vmatpush3.msra.mxu0 %v21_v1  ;;  %265 = vmatprep.subr.bf16.mxu1 %v294_v4  ;;  %v107_v7 = vld [vmem:[%s390_s3 + $0x18] sm:$0xff]  ;;  %v109_v11 = vld [vmem:[%s390_s3 + $0x28] sm:$0xff] }
   0x3   :  { %v104_v3 = vld [vmem:[%s390_s3] sm:$0xff]  ;;  %228 = vmatmul.mubr.msk.f32.vlgmr.msra.gmra.mrb[0].mxu0 %vm29_vm0, %v20_v2  ;;  %262 = vmatprep.mubr.msk.f32.mxu1 %vm293_vm1, %v292_v0  ;;  %v269_v9 = vpack.c.bf16 %v107_v7, %v106_v6  ;;  %v110_v13 = vld [vmem:[%s390_s3 + $0x30] sm:$0xff]  ;;  %v111_v14 = vld [vmem:[%s390_s3 + $0x38] sm:$0xff] }
   0x4   :  { %v266_v8 = vpack.c.bf16 %v105_v5, %v104_v3  ;;  %v108_v10 = vld [vmem:[%s390_s3 + $0x20] sm:$0xff]  ;;  %v275_v15 = vpack.c.bf16 %v111_v14, %v110_v13  ;;  %v113_v17 = vld [vmem:[%s390_s3 + $0x48] sm:$0xff]  ;;  %v114_v19 = vld [vmem:[%s390_s3 + $0x50] sm:$0xff] }
   0x5   :  { %v272_v12 = vpack.c.bf16 %v109_v11, %v108_v10  ;;  %v112_v16 = vld [vmem:[%s390_s3 + $0x40] sm:$0xff]  ;;  %v115_v20 = vld [vmem:[%s390_s3 + $0x58] sm:$0xff]  ;;  %v117_v23 = vld [vmem:[%s390_s3 + $0x68] sm:$0xff] }
   0x6   :  { %267 = vmatpush3.bf16.msra.mxu1 %v266_v8  ;;  %v278_v18 = vpack.c.bf16 %v113_v17, %v112_v16  ;;  %v281_v21 = vpack.c.bf16 %v115_v20, %v114_v19  ;;  %v116_v22 = vld [vmem:[%s390_s3 + $0x60] sm:$0xff]  ;;  %v118_v25 = vld [vmem:[%s390_s3 + $0x70] sm:$0xff]  ;;  %v119_v26 = vld [vmem:[%s390_s3 + $0x78] sm:$0xff] }
   0x7   :  { %268 = vmatprep.subr.bf16.mxu1 %v294_v4  ;;  %v284_v24 = vpack.c.bf16 %v117_v23, %v116_v22  ;;  %v287_v27 = vpack.c.bf16 %v119_v26, %v118_v25  ;;  %v203_v28 = vld [vmem:[%s391_s2] ss:$0 sm:$0xff] }
   0x8   :  { %v205_v33 = vld [vmem:[%s392_s4] ss:$0 sm:$0xff] }
   0xa   :  { %270 = vmatpush3.bf16.msra.mxu1 %v269_v9 }
   0xb   :  { %271 = vmatprep.subr.bf16.mxu1 %v294_v4 }
   0xe   :  { %273 = vmatpush3.bf16.msra.mxu1 %v272_v12 }
   0xf   :  { %274 = vmatprep.subr.bf16.mxu1 %v294_v4 }
  0x12   :  { %276 = vmatpush3.bf16.msra.mxu1 %v275_v15 }
  0x13   :  { %277 = vmatprep.subr.bf16.mxu1 %v294_v4 }
  0x16   :  { %279 = vmatpush3.bf16.msra.mxu1 %v278_v18 }
  0x17   :  { %280 = vmatprep.subr.bf16.mxu1 %v294_v4 }
  0x1a   :  { %282 = vmatpush3.bf16.msra.mxu1 %v281_v21 }
  0x1b   :  { %283 = vmatprep.subr.bf16.mxu1 %v294_v4 }
  0x1e   :  { %285 = vmatpush3.bf16.msra.mxu1 %v284_v24 }
  0x1f   :  { %286 = vmatprep.subr.bf16.mxu1 %v294_v4 }
  0x22   :  { %288 = vmatpush3.bf16.msra.mxu1 %v287_v27 }
  0xd6   :  { %v99_v29 = vpop.f32.mrb[0].mxu0 }
  0xd7   :  { %v100_v30 = vadd.f32 %v203_v28, %v99_v29  ;;  %v229_v31 = vpop.f32.mrb[1].mxu0 }
  0xd9   :  { %v103_v32 = vmax.f32 %v100_v30, 0.0 }
  0xdb   :  { %263 = vmatmul.mubr.f32.vlgmr.msra.gmra.mrb[0].mxu1 %v103_v32 }
 0x1ae   :  { %v193_v34 = vpop.f32.mrb[0].mxu1 }
 0x1af   :  { %v194_v35 = vadd.f32 %v205_v33, %v193_v34  ;;  %v264_v36 = vpop.f32.mrb[1].mxu1 }
 0x1b1   :  { %198 = vst.msk [vmem:[%s393_s5] sm:$0xff] %vm197_vm2, %v194_v35 }

</bundles_post_ra>
